<compile_context>
chip_gen: v7x
topology: tpu7x:2x2x1
jax: 0.10.0
libtpu: 0.0.40
codegen_flags: <defaults>
</compile_context>

<pallas_src>
import functools

import jax
import jax.numpy as jnp
import numpy as np
from jax import lax
from jax.experimental import pallas as pl
from jax.experimental.pallas import tpu as pltpu


def _round_up(a, b):
    return ((a + b - 1) // b) * b


# ----------------------------------------------------------------------------
# Kernel 1: reparameterized weight+bias sample (bf16, transposed layout) + KL sum
# ----------------------------------------------------------------------------
def _sample_kl_kernel(mu_ref, rho_ref, eps_ref, w_ref, kl_ref, *,
                      prior_mu, prior_sigma, n_rows, n_cols, block_rows):
    i = pl.program_id(0)
    mu = mu_ref[...]
    rho = rho_ref[...]
    # numerically stable softplus == torch.log1p(torch.exp(rho))
    sigma = jnp.maximum(rho, 0.0) + jnp.log1p(jnp.exp(-jnp.abs(rho)))
    w_ref[...] = (mu + sigma * eps_ref[...]).astype(w_ref.dtype)

    # KL only over the real (un-padded) parameter entries.
    row_ids = i * block_rows + lax.broadcasted_iota(jnp.int32, mu.shape, 0)
    col_ids = lax.broadcasted_iota(jnp.int32, mu.shape, 1)
    valid = (row_ids < n_rows) & (col_ids < n_cols)
    # NOTE: prior_sigma is the module's prior_variance used directly as a std,
    # matching the reference kl_div convention.
    kl_el = (
        jnp.log(prior_sigma + 1e-15)
        - jnp.log(sigma + 1e-15)
        + (sigma * sigma + (mu - prior_mu) ** 2) / (2.0 * prior_sigma * prior_sigma)
        - 0.5
    )
    blk = jnp.sum(jnp.where(valid, kl_el, 0.0), axis=(0, 1), keepdims=True)

    @pl.when(i == 0)
    def _():
        kl_ref[...] = jnp.zeros_like(kl_ref)

    kl_ref[...] += blk


def sample_weight_and_kl(mu_all, rho_all, eps_all, n_valid_rows, n_valid_cols,
                         prior_mean, prior_variance):
    """mu_all/rho_all/eps_all: (K_pad, Cout_pad) f32, zero-padded outside
    rows < n_valid_rows and cols < n_valid_cols.
    Returns (w_t bf16 (K_pad, Cout_pad), kl scalar f32)."""
    Kp, Cn = mu_all.shape
    tkr = min(512, Kp)
    while Kp % tkr:          # Kp is a multiple of 128, so this terminates at >= 128
        tkr -= 128
    grid = (Kp // tkr,)

    kernel = functools.partial(
        _sample_kl_kernel,
        prior_mu=float(prior_mean),
        prior_sigma=float(prior_variance),
        n_rows=int(n_valid_rows),
        n_cols=int(n_valid_cols),
        block_rows=int(tkr),
    )
    w_t, kl = pl.pallas_call(
        kernel,
        out_shape=(
            jax.ShapeDtypeStruct((Kp, Cn), jnp.bfloat16),
            jax.ShapeDtypeStruct((1, 1), jnp.float32),
        ),
        grid=grid,
        in_specs=[
            pl.BlockSpec((tkr, Cn), lambda i: (i, 0)),
            pl.BlockSpec((tkr, Cn), lambda i: (i, 0)),
            pl.BlockSpec((tkr, Cn), lambda i: (i, 0)),
        ],
        out_specs=(
            pl.BlockSpec((tkr, Cn), lambda i: (i, 0)),
            pl.BlockSpec((1, 1), lambda i: (0, 0)),   # resident KL accumulator
        ),
        compiler_params=pltpu.CompilerParams(dimension_semantics=("arbitrary",)),
    )(mu_all, rho_all, eps_all)
    return w_t, kl[0, 0]


# ----------------------------------------------------------------------------
# Kernel 2: conv3d hot path as tiled bf16 MXU matmul (bias folded into ones column)
# ----------------------------------------------------------------------------
def _conv_mm_kernel(p_ref, w_ref, o_ref, acc_ref):
    @pl.when(pl.program_id(1) == 0)
    def _():
        acc_ref[...] = jnp.zeros_like(acc_ref)

    acc_ref[...] += jnp.dot(p_ref[...], w_ref[...], preferred_element_type=jnp.float32)

    @pl.when(pl.program_id(1) == pl.num_programs(1) - 1)
    def _():
        o_ref[...] = acc_ref[...].astype(o_ref.dtype)


def conv_matmul(patches, w_t, tm_cap=512):
    """patches: (M, K_pad) bf16, w_t: (K_pad, Cout_pad) bf16 -> (M, Cout_pad) f32."""
    M, Kp = patches.shape
    Cn = w_t.shape[1]

    # M tile: multiple of 128, capped (VMEM-safe on v7x), keep grid >= 2 for megacore.
    Mp128 = _round_up(M, 128)
    tm = min(tm_cap, Mp128)
    if Mp128 // tm < 2 and Mp128 >= 256:
        tm = max(128, ((Mp128 // 2) // 128) * 128)
    Mpad = _round_up(M, tm)
    if Mpad != M:
        patches = jnp.pad(patches, ((0, Mpad - M), (0, 0)))

    tk = min(512, Kp)
    while Kp % tk:
        tk -= 128

    gm, gk = Mpad // tm, Kp // tk
    out = pl.pallas_call(
        _conv_mm_kernel,
        out_shape=jax.ShapeDtypeStruct((Mpad, Cn), jnp.float32),
        grid=(gm, gk),
        in_specs=[
            pl.BlockSpec((tm, tk), lambda i, j: (i, j)),
            pl.BlockSpec((tk, Cn), lambda i, j: (j, 0)),
        ],
        out_specs=pl.BlockSpec((tm, Cn), lambda i, j: (i, 0)),
        scratch_shapes=[pltpu.VMEM((tm, Cn), jnp.float32)],
        compiler_params=pltpu.CompilerParams(
            dimension_semantics=("parallel", "arbitrary")),
    )(patches, w_t)
    return out[:M]


# ----------------------------------------------------------------------------
# Glue: channels-last im2col for 3D conv (cross-correlation, PyTorch semantics)
# ----------------------------------------------------------------------------
def im2col3d_cl(x, k, stride, padding, dilation, K_pad):
    """x: (N, Cin, D, H, W) f32. Returns bf16 patches (M, K_pad) whose column K
    (== Cin*k^3) is a ones column (for the folded bias), plus output dims."""
    N, Cin, D, H, W = x.shape
    x_cl = jnp.transpose(x, (0, 2, 3, 4, 1)).astype(jnp.bfloat16)   # NDHWC, bf16
    xp = jnp.pad(
        x_cl,
        ((0, 0), (padding, padding), (padding, padding), (padding, padding), (0, 0)),
    )
    Dp, Hp, Wp = D + 2 * padding, H + 2 * padding, W + 2 * padding
    Do = (Dp - dilation * (k - 1) - 1) // stride + 1
    Ho = (Hp - dilation * (k - 1) - 1) // stride + 1
    Wo = (Wp - dilation * (k - 1) - 1) // stride + 1

    taps = []
    for kd in range(k):
        for kh in range(k):
            for kw in range(k):
                d0, h0, w0 = kd * dilation, kh * dilation, kw * dilation
                sl = xp[
                    :,
                    d0: d0 + (Do - 1) * stride + 1: stride,
                    h0: h0 + (Ho - 1) * stride + 1: stride,
                    w0: w0 + (Wo - 1) * stride + 1: stride,
                    :,
                ]
                taps.append(sl)                       # (N, Do, Ho, Wo, Cin)
    cols = jnp.stack(taps, axis=4)                    # (N, Do, Ho, Wo, k^3, Cin)
    M = N * Do * Ho * Wo
    K = Cin * k * k * k
    patches = cols.reshape(M, K)                      # K-order: (kd, kh, kw, Cin)
    pad_cols = K_pad - K                              # >= 1 (room for the bias column)
    extra = jnp.zeros((M, pad_cols), jnp.bfloat16).at[:, 0].set(1.0)
    patches = jnp.concatenate([patches, extra], axis=1)
    return patches, (N, Do, Ho, Wo)


# ----------------------------------------------------------------------------
# Forward pass matching Conv3dVariational.forward (groups=1)
# ----------------------------------------------------------------------------
def conv3d_variational_forward(
    x,
    mu_kernel,
    rho_kernel,
    eps_kernel,
    mu_bias,
    rho_bias,
    eps_bias,
    prior_mean,
    prior_variance,
    stride=1,
    padding=0,
    dilation=1,
):
    Cout, Cin, k, _, _ = mu_kernel.shape
    K = Cin * k * k * k
    Kb = K + 1                                   # + bias row
    K_pad = _round_up(Kb, 128)
    Cn = _round_up(Cout, 128)

    # Pack weight params in (K, Cout) layout (K-order (kd, kh, kw, Cin) to match the
    # channels-last im2col) with the bias as row K, zero-padded to (K_pad, Cn).
    # The padding rows/cols sample to exactly 0 (mu = eps = 0) so they are inert in
    # the matmul, and the KL mask inside the kernel excludes them.
    def pack(mk, mb):
        w = jnp.transpose(mk, (2, 3, 4, 1, 0)).reshape(K, Cout).astype(jnp.float32)
        full = jnp.zeros((K_pad, Cn), jnp.float32)
        full = full.at[:K, :Cout].set(w)
        full = full.at[K, :Cout].set(mb.astype(jnp.float32))
        return full

    mu_all = pack(mu_kernel, mu_bias)
    rho_all = pack(rho_kernel, rho_bias)
    eps_all = pack(eps_kernel, eps_bias)

    # weight/bias = mu + softplus(rho) * eps ; kl = kl_weight + kl_bias  (kernel 1)
    w_t, kl = sample_weight_and_kl(mu_all, rho_all, eps_all, Kb, Cout,
                                   prior_mean, prior_variance)

    # conv3d hot path: im2col (XLA glue) + Pallas MXU matmul (kernel 2)
    patches, (N, Do, Ho, Wo) = im2col3d_cl(x, k, stride, padding, dilation, K_pad)
    out2d = conv_matmul(patches, w_t)                               # (M, Cn) f32
    out = (
        out2d[:, :Cout]
        .reshape(N, Do, Ho, Wo, Cout)
        .transpose(0, 4, 1, 2, 3)     # back to NCDHW to match PyTorch module output
    )
    return out, kl, w_t


if __name__ == "__main__":
    # --- module hyperparameters (small, consistent with the PyTorch module) ---
    prior_mean = 0.0
    prior_variance = 1.0
    posterior_rho_init = -3.0
    in_channels, out_channels, kernel_size = 4, 8, 3
    stride, padding, dilation = 1, 0, 1

    N, D, H, W = 2, 8, 8, 8

    key = jax.random.PRNGKey(0)
    k_mu, k_rho, k_eps, k_bmu, k_brho, k_beps, k_x = jax.random.split(key, 7)

    wshape = (out_channels, in_channels, kernel_size, kernel_size, kernel_size)
    # deterministic parameter "init" mirroring init_parameters() + .normal_() sampling
    mu_kernel = 0.1 * jax.random.normal(k_mu, wshape, jnp.float32)
    rho_kernel = posterior_rho_init + 0.1 * jax.random.normal(k_rho, wshape, jnp.float32)
    eps_kernel = jax.random.normal(k_eps, wshape, jnp.float32)
    mu_bias = 0.1 * jax.random.normal(k_bmu, (out_channels,), jnp.float32)
    rho_bias = posterior_rho_init + 0.1 * jax.random.normal(k_brho, (out_channels,), jnp.float32)
    eps_bias = jax.random.normal(k_beps, (out_channels,), jnp.float32)

    x = jax.random.normal(k_x, (N, in_channels, D, H, W), jnp.float32)

    out, kl, w_t = conv3d_variational_forward(
        x,
        mu_kernel,
        rho_kernel,
        eps_kernel,
        mu_bias,
        rho_bias,
        eps_bias,
        prior_mean,
        prior_variance,
        stride=stride,
        padding=padding,
        dilation=dilation,
    )
    out = jax.block_until_ready(out)
    kl = jax.block_until_ready(kl)

    # --- correctness: compare against XLA's conv using the SAME bf16 sampled operands ---
    K = in_channels * kernel_size ** 3
    w_blk = w_t[:K, :out_channels]                       # (K, Cout) bf16, K-order (kd,kh,kw,Cin)
    w_oidhw = jnp.transpose(
        w_blk.reshape(kernel_size, kernel_size, kernel_size, in_channels, out_channels),
        (4, 3, 0, 1, 2),
    )                                                    # (Cout, Cin, kd, kh, kw) bf16
    b_sampled = w_t[K, :out_channels].astype(jnp.float32)

    ref = lax.conv_general_dilated(
        x.astype(jnp.bfloat16),
        w_oidhw,
        window_strides=(stride,) * 3,
        padding=[(padding, padding)] * 3,
        rhs_dilation=(dilation,) * 3,
        dimension_numbers=("NCDHW", "OIDHW", "NCDHW"),
        preferred_element_type=jnp.float32,
    ) + b_sampled.reshape(1, out_channels, 1, 1, 1)
    np.testing.assert_allclose(np.asarray(out), np.asarray(ref), rtol=1e-3, atol=1e-3)

    # --- KL check (analytic, f32) ---
    def softplus(r):
        return jnp.maximum(r, 0.0) + jnp.log1p(jnp.exp(-jnp.abs(r)))

    def kl_ref(mu_q, sigma_q, mu_p, sigma_p):
        return jnp.sum(
            jnp.log(sigma_p + 1e-15)
            - jnp.log(sigma_q + 1e-15)
            + (sigma_q ** 2 + (mu_q - mu_p) ** 2) / (2 * sigma_p ** 2)
            - 0.5
        )

    kl_expected = kl_ref(mu_kernel, softplus(rho_kernel), prior_mean, prior_variance) + kl_ref(
        mu_bias, softplus(rho_bias), prior_mean, prior_variance
    )
    np.testing.assert_allclose(float(kl), float(kl_expected), rtol=1e-4, atol=1e-4)

    print("KERNEL_OK")
</pallas_src>

<mosaic_0001>
module attributes {stable_mosaic.version = 11 : i64} {
  func.func @_sample_kl_kernel(%arg0: i32, %arg1: memref<128x128xf32, #tpu.memory_space<vmem>>, %arg2: memref<128x128xf32, #tpu.memory_space<vmem>>, %arg3: memref<128x128xf32, #tpu.memory_space<vmem>>, %arg4: memref<128x128xbf16, #tpu.memory_space<vmem>>, %arg5: memref<1x1xf32, #tpu.memory_space<vmem>>) attributes {dimension_semantics = [#tpu.dimension_semantics<arbitrary>], iteration_bounds = array<i64: 1>, scalar_prefetch = 0 : i64, scratch_operands = 0 : i64, tpu.core_type = #tpu.core_type<tc>, window_params = [{transform_indices = @transform_0, window_bounds = array<i64: 128, 128>}, {transform_indices = @transform_1, window_bounds = array<i64: 128, 128>}, {transform_indices = @transform_2, window_bounds = array<i64: 128, 128>}, {transform_indices = @transform_3, window_bounds = array<i64: 128, 128>}, {pipeline_mode = #tpu.pipeline_mode<synchronous>, transform_indices = @transform_4, window_bounds = array<i64: 1, 1>}]} {
    %c0 = arith.constant 0 : index
    %c0_0 = arith.constant 0 : index
    %0 = vector.load %arg1[%c0, %c0_0] : memref<128x128xf32, #tpu.memory_space<vmem>>, vector<128x128xf32>
    %c0_1 = arith.constant 0 : index
    %c0_2 = arith.constant 0 : index
    %1 = vector.load %arg2[%c0_1, %c0_2] : memref<128x128xf32, #tpu.memory_space<vmem>>, vector<128x128xf32>
    %cst = arith.constant 0.000000e+00 : f32
    %2 = vector.broadcast %cst : f32 to vector<128x128xf32>
    %3 = arith.maximumf %1, %2 : vector<128x128xf32>
    %4 = math.absf %1 : vector<128x128xf32>
    %cst_3 = arith.constant 0.000000e+00 : f32
    %5 = vector.broadcast %cst_3 : f32 to vector<128x128xf32>
    %6 = arith.subf %5, %4 : vector<128x128xf32>
    %7 = math.exp %6 : vector<128x128xf32>
    %8 = math.log1p %7 : vector<128x128xf32>
    %9 = arith.addf %3, %8 : vector<128x128xf32>
    %c0_4 = arith.constant 0 : index
    %c0_5 = arith.constant 0 : index
    %10 = vector.load %arg3[%c0_4, %c0_5] : memref<128x128xf32, #tpu.memory_space<vmem>>, vector<128x128xf32>
    %11 = arith.mulf %9, %10 : vector<128x128xf32>
    %12 = arith.addf %0, %11 : vector<128x128xf32>
    %13 = arith.truncf %12 : vector<128x128xf32> to vector<128x128xbf16>
    %c0_6 = arith.constant 0 : index
    %c0_7 = arith.constant 0 : index
    %14 = vector.load %arg4[%c0_6, %c0_7] : memref<128x128xbf16, #tpu.memory_space<vmem>>, vector<128x128xbf16>
    tpu.vector_store %arg4[%c0_6, %c0_7], %13 {strides = array<i32>} : memref<128x128xbf16, #tpu.memory_space<vmem>>, vector<128x128xbf16>,
    %c128_i32 = arith.constant 128 : i32
    %15 = arith.muli %arg0, %c128_i32 : i32
    %16 = tpu.iota {dimensions = array<i32: 0>} : vector<128x128xi32>
    %17 = vector.broadcast %15 : i32 to vector<128x128xi32>
    %18 = arith.addi %17, %16 : vector<128x128xi32>
    %19 = tpu.iota {dimensions = array<i32: 1>} : vector<128x128xi32>
    %c109_i32 = arith.constant 109 : i32
    %20 = vector.broadcast %c109_i32 : i32 to vector<128x128xi32>
    %21 = arith.cmpi slt, %18, %20 : vector<128x128xi32>
    %c8_i32 = arith.constant 8 : i32
    %22 = vector.broadcast %c8_i32 : i32 to vector<128x128xi32>
    %23 = arith.cmpi slt, %19, %22 : vector<128x128xi32>
    %24 = arith.andi %21, %23 : vector<128x128xi1>
    %cst_8 = arith.constant 1.000000e+00 : f32
    %25 = math.log %cst_8 : f32
    %cst_9 = arith.constant 1.000000e-15 : f32
    %26 = vector.broadcast %cst_9 : f32 to vector<128x128xf32>
    %27 = arith.addf %9, %26 : vector<128x128xf32>
    %28 = math.log %27 : vector<128x128xf32>
    %29 = vector.broadcast %25 : f32 to vector<128x128xf32>
    %30 = arith.subf %29, %28 : vector<128x128xf32>
    %31 = arith.mulf %9, %9 : vector<128x128xf32>
    %cst_10 = arith.constant 0.000000e+00 : f32
    %32 = vector.broadcast %cst_10 : f32 to vector<128x128xf32>
    %33 = arith.subf %0, %32 : vector<128x128xf32>
    %34 = arith.mulf %33, %33 : vector<128x128xf32>
    %35 = arith.addf %31, %34 : vector<128x128xf32>
    %cst_11 = arith.constant 2.000000e+00 : f32
    %36 = vector.broadcast %cst_11 : f32 to vector<128x128xf32>
    %37 = arith.divf %35, %36 : vector<128x128xf32>
    %38 = arith.addf %30, %37 : vector<128x128xf32>
    %cst_12 = arith.constant 5.000000e-01 : f32
    %39 = vector.broadcast %cst_12 : f32 to vector<128x128xf32>
    %40 = arith.subf %38, %39 : vector<128x128xf32>
    %cst_13 = arith.constant 0.000000e+00 : f32
    %41 = vector.broadcast %cst_13 : f32 to vector<128x128xf32>
    %42 = arith.select %24, %40, %41 : vector<128x128xi1>, vector<128x128xf32>
    %43 = vector.shape_cast %42 : vector<128x128xf32> to vector<1x128x128xf32>
    %cst_14 = arith.constant dense<0.000000e+00> : vector<1xf32>
    %44 = vector.multi_reduction <add>, %43, %cst_14 [1, 2] : vector<1x128x128xf32> to vector<1xf32>
    %45 = vector.shape_cast %44 : vector<1xf32> to vector<1x1x1xf32>
    %46 = vector.extract %45[0, 0, 0] : f32 from vector<1x1x1xf32>
    %47 = vector.broadcast %46 : f32 to vector<1x1xf32>
    %c0_i32 = arith.constant 0 : i32
    %48 = arith.cmpi eq, %arg0, %c0_i32 : i32
    %49 = arith.extui %48 : i1 to i32
    %c0_i32_15 = arith.constant 0 : i32
    %50 = arith.cmpi ne, %49, %c0_i32_15 : i32
    scf.if %50 {
      %cst_20 = arith.constant 0.000000e+00 : f32
      %54 = vector.broadcast %cst_20 : f32 to vector<1x1xf32>
      %c0_21 = arith.constant 0 : index
      %c0_22 = arith.constant 0 : index
      %55 = vector.load %arg5[%c0_21, %c0_22] : memref<1x1xf32, #tpu.memory_space<vmem>>, vector<1x1xf32>
      tpu.vector_store %arg5[%c0_21, %c0_22], %54 {strides = array<i32>} : memref<1x1xf32, #tpu.memory_space<vmem>>, vector<1x1xf32>,
    } else {
    }
    %c0_16 = arith.constant 0 : index
    %c0_17 = arith.constant 0 : index
    %51 = vector.load %arg5[%c0_16, %c0_17] : memref<1x1xf32, #tpu.memory_space<vmem>>, vector<1x1xf32>
    %52 = arith.addf %51, %47 : vector<1x1xf32>
    %c0_18 = arith.constant 0 : index
    %c0_19 = arith.constant 0 : index
    %53 = vector.load %arg5[%c0_18, %c0_19] : memref<1x1xf32, #tpu.memory_space<vmem>>, vector<1x1xf32>
    tpu.vector_store %arg5[%c0_18, %c0_19], %52 {strides = array<i32>} : memref<1x1xf32, #tpu.memory_space<vmem>>, vector<1x1xf32>,
    return
  }
  func.func @transform_0(%arg0: i32) -> (i32, i32) {
    %c0_i32 = arith.constant 0 : i32
    %c0_i32_0 = arith.constant 0 : i32
    return %arg0, %c0_i32 : i32, i32
  }
  func.func @transform_1(%arg0: i32) -> (i32, i32) {
    %c0_i32 = arith.constant 0 : i32
    %c0_i32_0 = arith.constant 0 : i32
    return %arg0, %c0_i32 : i32, i32
  }
  func.func @transform_2(%arg0: i32) -> (i32, i32) {
    %c0_i32 = arith.constant 0 : i32
    %c0_i32_0 = arith.constant 0 : i32
    return %arg0, %c0_i32 : i32, i32
  }
  func.func @transform_3(%arg0: i32) -> (i32, i32) {
    %c0_i32 = arith.constant 0 : i32
    %c0_i32_0 = arith.constant 0 : i32
    return %arg0, %c0_i32 : i32, i32
  }
  func.func @transform_4(%arg0: i32) -> (i32, i32) {
    %c0_i32 = arith.constant 0 : i32
    %c0_i32_0 = arith.constant 0 : i32
    %c0_i32_1 = arith.constant 0 : i32
    return %c0_i32, %c0_i32_0 : i32, i32
  }
}

</mosaic_0001>

<bundles_post_ra>
// kernel: tpu_custom_call.1
= control target key start
LH: loop header
LB: loop body
LE: loop exit
PB: predicated region body
PF: predicated region fallthrough
CT: control target
= control target key end

     0   :  { %10 = vsyncpa [#allocation3], 0  ;;  %s1735_s0 = inlined_call_operand.hbm [shape: f32[128,128], index: 0, kind: input, shape index: {}]   ;;  %s1736_s1 = inlined_call_operand.hbm [shape: f32[128,128], index: 1, kind: input, shape index: {}]   ;;  %s1737_s2 = inlined_call_operand.hbm [shape: f32[128,128], index: 2, kind: input, shape index: {}]   ;;  %s1738_s3 = inlined_call_operand.hbm [shape: bf16[128,128], index: 3, kind: output, shape index: {0}]   ;;  %s1739_s4 = inlined_call_operand.hbm [shape: f32[1,1], index: 4, kind: output, shape index: {1}]  }
   0x1   :  { %11 = vsyncpa [#allocation6], 0 }
   0x2   :  { %12 = vsyncpa [#allocation4], 0 }
   0x3   :  { %13 = vsyncpa [#allocation10], 0  ;;  %s1090_s15 = smov [#allocation5]   ;;  %s1091_s17 = smov [#allocation2]  }
   0x4   :  { %s31_s16 = sshll.u32 %s1090_s15, 4  ;;  %s19_s18 = sshll.u32 %s1091_s17, 4  ;;  %s32_s16 = int_to_ptr.vmem [resolvable:$true] %s31_s16  ;;  %s1125_s18 = int_to_ptr.vmem [resolvable:$true] %s19_s18 }
   0x5   :  { %s972_s21 = scalar_lea.hbm %s1736_s1, 2048 }
   0x6   :  { %p973_p0 = scmp.ne.s32.totalorder %s1736_s1, %s972_s21  ;;  %p976_p1 = scmp.lt.u32.totalorder %s972_s21, %s1736_s1 }
   0x8   :  { %p978_p2 = pnand %p976_p1, %p973_p0 }
   0xa   :  { %981 = shalt.err (!%p978_p2)
}
   0xb   :  { %s982_s26 = scalar_lea.vmem %s32_s16, 2048  ;;  %p987_p4 = scmp.lt.s32.totalorder %s32_s16, %s32_s16 }
   0xc   :  { %p983_p3 = scmp.ne.s32.totalorder %s32_s16, %s982_s26  ;;  %p988_p5 = scmp.lt.s32.totalorder %s982_s26, %s982_s26 }
   0xe   :  { %p989_p6 = por %p988_p5, %p987_p4 }
  0x10   :  { %p990_p7 = pnand %p989_p6, %p983_p3 }
  0x12   :  { %993 = shalt.err (!%p990_p7)
}
  0x13   :  { %s1092_s27 = smov 128   ;;  %s1093_s28 = smov 8  }
  0x14   :  { %37 = dma.hbm_to_vmem [thread:$0]  %s1736_s1, 2048, %s32_s16, [#allocation6], %s1092_s27, %s1092_s27, %s1093_s28  }
  0x15   :  { %s994_s7 = scalar_lea.hbm %s1735_s0, 2048 }
  0x16   :  { %p995_p8 = scmp.ne.s32.totalorder %s1735_s0, %s994_s7  ;;  %p998_p9 = scmp.lt.u32.totalorder %s994_s7, %s1735_s0 }
  0x18   :  { %p1000_p10 = pnand %p998_p9, %p995_p8 }
  0x1a   :  { %1003 = shalt.err (!%p1000_p10)
}
  0x1b   :  { %s1004_s12 = scalar_lea.vmem %s1125_s18, 2048  ;;  %p1009_p12 = scmp.lt.s32.totalorder %s1125_s18, %s1125_s18 }
  0x1c   :  { %p1005_p11 = scmp.ne.s32.totalorder %s1125_s18, %s1004_s12  ;;  %p1010_p13 = scmp.lt.s32.totalorder %s1004_s12, %s1004_s12 }
  0x1e   :  { %p1011_p0 = por %p1010_p13, %p1009_p12 }
  0x20   :  { %p1012_p1 = pnand %p1011_p0, %p1005_p11 }
  0x22   :  { %1015 = shalt.err (!%p1012_p1)
}
  0x23   :  { %25 = dma.hbm_to_vmem [thread:$0]  %s1735_s0, 2048, %s1125_s18, [#allocation3], %s1092_s27, %s1092_s27, %s1093_s28  }
  0x24   :  { %s1094_s14 = smov [#allocation7]   ;;  %s1016_s19 = scalar_lea.hbm %s1737_s2, 2048 }
  0x25   :  { %s43_s15 = sshll.u32 %s1094_s14, 4  ;;  %p1017_p2 = scmp.ne.s32.totalorder %s1737_s2, %s1016_s19  ;;  %s44_s15 = int_to_ptr.vmem [resolvable:$true] %s43_s15 }
  0x26   :  { %p1020_p3 = scmp.lt.u32.totalorder %s1016_s19, %s1737_s2 }
  0x28   :  { %p1022_p4 = pnand %p1020_p3, %p1017_p2 }
  0x2a   :  { %1025 = shalt.err (!%p1022_p4)
}
  0x2b   :  { %s1026_s24 = scalar_lea.vmem %s44_s15, 2048  ;;  %p1031_p6 = scmp.lt.s32.totalorder %s44_s15, %s44_s15 }
  0x2c   :  { %p1027_p5 = scmp.ne.s32.totalorder %s44_s15, %s1026_s24  ;;  %p1032_p7 = scmp.lt.s32.totalorder %s1026_s24, %s1026_s24 }
  0x2e   :  { %p1033_p8 = por %p1032_p7, %p1031_p6 }
  0x30   :  { %p1034_p9 = pnand %p1033_p8, %p1027_p5 }
  0x32   :  { %1037 = shalt.err (!%p1034_p9)
}
  0x33   :  { %49 = dma.hbm_to_vmem [thread:$0]  %s1737_s2, 2048, %s44_s15, [#allocation6], %s1092_s27, %s1092_s27, %s1093_s28  }
  0x34   :  { %1082 = dma.done.wait [#allocation3], 2048  }
  0x35   :  { %1083 = vsyncadd [#allocation3], 4294965248 }
  0x36   :  { %1084 = dma.done.wait [#allocation6], 4096  }
  0x37   :  { %1085 = vsyncadd [#allocation6], 4294963200  ;;  %v1177_v0 = vld [vmem:[#allocation5] sm:$0xff]  ;;  %v1179_v1 = vld [vmem:[#allocation5 + $0x8] sm:$0xff]  ;;  %s1096_s2 = smov [#allocation8]  }
  0x38   :  { %v1181_v2 = vld [vmem:[#allocation5 + $0x10] sm:$0xff]  ;;  %v1183_v3 = vld [vmem:[#allocation5 + $0x18] sm:$0xff]  ;;  %v1185_v4 = vld [vmem:[#allocation5 + $0x20] sm:$0xff]  ;;  %v107_v6 = vand.u32 2147483647, %v1177_v0  ;;  %v91_v21 = vmax.f32 %v1177_v0, 0.0 }
  0x39   :  { %v1187_v5 = vld [vmem:[#allocation5 + $0x28] sm:$0xff]  ;;  %v108_v7 = vand.u32 2147483647, %v1179_v1  ;;  %v1191_v8 = vld [vmem:[#allocation5 + $0x30] sm:$0xff]  ;;  %v109_v9 = vand.u32 2147483647, %v1181_v2 }
  0x3a   :  { %v110_v10 = vand.u32 2147483647, %v1183_v3  ;;  %v1195_v11 = vld [vmem:[#allocation5 + $0x38] sm:$0xff]  ;;  %v111_v12 = vand.u32 2147483647, %v1185_v4  ;;  %v1198_v13 = vld [vmem:[#allocation5 + $0x40] sm:$0xff] }
  0x3b   :  { %v1200_v14 = vld [vmem:[#allocation5 + $0x48] sm:$0xff]  ;;  %v112_v15 = vand.u32 2147483647, %v1187_v5  ;;  %v1203_v16 = vld [vmem:[#allocation5 + $0x50] sm:$0xff]  ;;  %v1205_v17 = vld [vmem:[#allocation5 + $0x58] sm:$0xff]  ;;  %v123_v19 = vsub.f32 0.0, %v107_v6 }
  0x3c   :  { %v113_v18 = vand.u32 2147483647, %v1191_v8  ;;  %v124_v20 = vsub.f32 0.0, %v108_v7  ;;  %v114_v22 = vand.u32 2147483647, %v1195_v11  ;;  %v125_v23 = vsub.f32 0.0, %v109_v9 }
  0x3d   :  { %v126_v24 = vsub.f32 0.0, %v110_v10  ;;  %v92_v25 = vmax.f32 %v1179_v1, 0.0  ;;  %v115_v26 = vand.u32 2147483647, %v1198_v13  ;;  %v116_v27 = vand.u32 2147483647, %v1200_v14 }
  0x3e   :  { %v127_v28 = vsub.f32 0.0, %v111_v12  ;;  %v1213_v29 = vld [vmem:[#allocation5 + $0x60] sm:$0xff]  ;;  %v117_v30 = vand.u32 2147483647, %v1203_v16  ;;  %v118_v31 = vand.u32 2147483647, %v1205_v17 }
  0x3f   :  { %v128_v32 = vsub.f32 0.0, %v112_v15  ;;  %v1217_v33 = vld [vmem:[#allocation5 + $0x68] sm:$0xff]  ;;  %v129_v34 = vsub.f32 0.0, %v113_v18  ;;  %v139_v35 = vmul.f32 1.442695, %v123_v19  ;;  %v1219_v37 = vld [vmem:[#allocation5 + $0x70] sm:$0xff] }
  0x40   :  { %v141_v36 = vmul.f32 1.442695, %v124_v20  ;;  %v130_v38 = vsub.f32 0.0, %v114_v22  ;;  %v143_v39 = vmul.f32 1.442695, %v125_v23  ;;  %v1221_v41 = vld [vmem:[#allocation5 + $0x78] sm:$0xff] }
  0x41   :  { %v145_v40 = vmul.f32 1.442695, %v126_v24  ;;  %v119_v42 = vand.u32 2147483647, %v1213_v29  ;;  %v131_v43 = vsub.f32 0.0, %v115_v26  ;;  %880 = vpow2.f32 %v139_v35  ;;  %s746_s25 = sshll.u32 %s1096_s2, 4  ;;  %s747_s25 = int_to_ptr.vmem [resolvable:$true] %s746_s25 }
  0x42   :  { %v147_v44 = vmul.f32 1.442695, %v127_v28  ;;  %v120_v45 = vand.u32 2147483647, %v1217_v33  ;;  %v132_v46 = vsub.f32 0.0, %v116_v27  ;;  %882 = vpow2.f32 %v141_v36  ;;  %s1038_s26 = scalar_lea.vmem %s747_s25, 1024  ;;  %p1043_p11 = scmp.lt.s32.totalorder %s747_s25, %s747_s25 }
  0x43   :  { %v149_v47 = vmul.f32 1.442695, %v128_v32  ;;  %v121_v48 = vand.u32 2147483647, %v1219_v37  ;;  %v133_v49 = vsub.f32 0.0, %v117_v30  ;;  %884 = vpow2.f32 %v143_v39  ;;  %p1039_p10 = scmp.ne.s32.totalorder %s747_s25, %s1038_s26  ;;  %p1044_p12 = scmp.lt.s32.totalorder %s1038_s26, %s1038_s26 }
  0x44   :  { %v151_v50 = vmul.f32 1.442695, %v129_v34  ;;  %v122_v51 = vand.u32 2147483647, %v1221_v41  ;;  %v134_v52 = vsub.f32 0.0, %v118_v31  ;;  %886 = vpow2.f32 %v145_v40 }
  0x45   :  { %v153_v53 = vmul.f32 1.442695, %v130_v38  ;;  %v93_v54 = vmax.f32 %v1181_v2, 0.0  ;;  %v135_v55 = vsub.f32 0.0, %v119_v42  ;;  %888 = vpow2.f32 %v147_v44  ;;  %p1045_p13 = por %p1044_p12, %p1043_p11 }
  0x46   :  { %v155_v56 = vmul.f32 1.442695, %v131_v43  ;;  %v136_v58 = vsub.f32 0.0, %v120_v45  ;;  %890 = vpow2.f32 %v149_v47  ;;  %v157_v59 = vmul.f32 1.442695, %v132_v46 }
  0x47   :  { %v137_v61 = vsub.f32 0.0, %v121_v48  ;;  %892 = vpow2.f32 %v151_v50  ;;  %v159_v62 = vmul.f32 1.442695, %v133_v49  ;;  %v138_v6 = vsub.f32 0.0, %v122_v51  ;;  %p1046_p0 = pnand %p1045_p13, %p1039_p10 }
  0x48   :  { %894 = vpow2.f32 %v153_v53  ;;  %v161_v7 = vmul.f32 1.442695, %v134_v52  ;;  %v163_v12 = vmul.f32 1.442695, %v135_v55  ;;  %v165_v19 = vmul.f32 1.442695, %v136_v58 }
  0x49   :  { %896 = vpow2.f32 %v155_v56  ;;  %v167_v24 = vmul.f32 1.442695, %v137_v61  ;;  %v169_v28 = vmul.f32 1.442695, %v138_v6  ;;  %v1774_v6 = vmax.f32 %v1185_v4, 0.0  ;;  %v333_v4 = vld [vmem:[#allocation7 + $0x10] sm:$0xff] }
  0x4a   :  { %898 = vpow2.f32 %v157_v59 }
  0x4b   :  { %v881_v20 = vpop.eup %880  ;;  %900 = vpow2.f32 %v159_v62 }
  0x4c   :  { %v883_v26 = vpop.eup %882  ;;  %902 = vpow2.f32 %v161_v7  ;;  %v174_v30 = vmul.f32 -0.5, %v881_v20  ;;  %v171_v34 = vadd.f32 1.0, %v881_v20  ;;  %v177_v39 = vand.u32 2147483647, %v881_v20 }
  0x4d   :  { %v885_v31 = vpop.eup %884  ;;  %904 = vpow2.f32 %v163_v12  ;;  %v183_v35 = vmul.f32 -0.5, %v883_v26  ;;  %v180_v40 = vadd.f32 1.0, %v883_v26  ;;  %v186_v48 = vand.u32 2147483647, %v883_v26 }
  0x4e   :  { %v887_v36 = vpop.eup %886  ;;  %906 = vpow2.f32 %v165_v19  ;;  %v175_v43 = vadd.f32 1.0, %v174_v30  ;;  %v189_v44 = vadd.f32 1.0, %v885_v31  ;;  %v192_v45 = vmul.f32 -0.5, %v885_v31 }
  0x4f   :  { %v889_v42 = vpop.eup %888  ;;  %908 = vpow2.f32 %v167_v24  ;;  %v184_v47 = vadd.f32 1.0, %v183_v35  ;;  %v198_v49 = vadd.f32 1.0, %v887_v36  ;;  %v195_v52 = vand.u32 2147483647, %v885_v31 }
  0x50   :  { %v891_v46 = vpop.eup %890  ;;  %910 = vpow2.f32 %v169_v28  ;;  %v193_v51 = vadd.f32 1.0, %v192_v45  ;;  %v201_v53 = vmul.f32 -0.5, %v887_v36  ;;  %v204_v58 = vand.u32 2147483647, %v887_v36 }
  0x51   :  { %v893_v50 = vpop.eup %892  ;;  %912 = vlog2.f32 %v171_v34  ;;  %v207_v59 = vadd.f32 1.0, %v889_v42  ;;  %v1245_v62 = vmul.f32 %v881_v20, %v175_v43  ;;  %vm1247_vm0 = vcmp.lt.f32.partialorder %v177_v39, 0.0004427343 }
  0x52   :  { %v1240_v55 = vpop.eup %894  ;;  %914 = vlog2.f32 %v180_v40  ;;  %v202_v7 = vadd.f32 1.0, %v201_v53  ;;  %v210_v12 = vmul.f32 -0.5, %v889_v42  ;;  %v1253_v24 = vmul.f32 %v883_v26, %v184_v47 }
  0x53   :  { %v1243_v61 = vpop.eup %896  ;;  %916 = vlog2.f32 %v189_v44  ;;  %v213_v28 = vand.u32 2147483647, %v889_v42  ;;  %v216_v30 = vadd.f32 1.0, %v891_v46  ;;  %vm1257_vm1 = vcmp.lt.f32.partialorder %v186_v48, 0.0004427343 }
  0x54   :  { %v1251_v19 = vpop.eup %898  ;;  %918 = vlog2.f32 %v198_v49  ;;  %v1261_v20 = vmul.f32 %v885_v31, %v193_v51  ;;  %vm1263_vm2 = vcmp.lt.f32.partialorder %v195_v52, 0.0004427343  ;;  %v211_v40 = vadd.f32 1.0, %v210_v12 }
  0x55   :  { %v1255_v34 = vpop.eup %900  ;;  %920 = vlog2.f32 %v207_v59  ;;  %v219_v43 = vmul.f32 -0.5, %v891_v46  ;;  %vm1269_vm3 = vcmp.lt.f32.partialorder %v204_v58, 0.0004427343  ;;  %v222_v45 = vand.u32 2147483647, %v891_v46 }
  0x56   :  { %v1267_v26 = vpop.eup %902  ;;  %922 = vlog2.f32 %v216_v30  ;;  %v225_v47 = vadd.f32 1.0, %v893_v50  ;;  %v1275_v31 = vmul.f32 %v887_v36, %v202_v7  ;;  %v228_v51 = vmul.f32 -0.5, %v893_v50 }
  0x57   :  { %v1273_v48 = vpop.eup %904  ;;  %v220_v49 = vadd.f32 1.0, %v219_v43  ;;  %v231_v52 = vand.u32 2147483647, %v893_v50  ;;  %vm1279_vm4 = vcmp.lt.f32.partialorder %v213_v28, 0.0004427343  ;;  %v234_v58 = vadd.f32 1.0, %v1240_v55 }
  0x58   :  { %v1277_v53 = vpop.eup %906  ;;  %924 = vlog2.f32 %v225_v47  ;;  %v237_v12 = vmul.f32 -0.5, %v1240_v55  ;;  %v1287_v56 = vmul.f32 %v889_v42, %v211_v40  ;;  %vm1289_vm5 = vcmp.lt.f32.partialorder %v222_v45, 0.0004427343 }
  0x59   :  { %v1285_v30 = vpop.eup %908  ;;  %v229_v7 = vadd.f32 1.0, %v228_v51  ;;  %v240_v43 = vand.u32 2147483647, %v1240_v55  ;;  %926 = vlog2.f32 %v234_v58  ;;  %v243_v47 = vadd.f32 1.0, %v1243_v61 }
  0x5a   :  { %v1294_v28 = vpop.eup %910  ;;  %v238_v38 = vadd.f32 1.0, %v237_v12  ;;  %v246_v32 = vmul.f32 -0.5, %v1243_v61  ;;  %v1298_v23 = vmul.f32 %v891_v46, %v220_v49  ;;  %vm1300_vm6 = vcmp.lt.f32.partialorder %v231_v52, 0.0004427343 }
  0x5b   :  { %v913_v27 = vpop.eup %912  ;;  %v249_v40 = vand.u32 2147483647, %v1243_v61  ;;  %v252_v45 = vadd.f32 1.0, %v1251_v19  ;;  %v1308_v58 = vmul.f32 %v893_v50, %v229_v7  ;;  %928 = vlog2.f32 %v243_v47 }
  0x5c   :  { %v915_v51 = vpop.eup %914  ;;  %v1306_v22 = vmul.f32 0.6931472, %v913_v27  ;;  %v247_v12 = vadd.f32 1.0, %v246_v32  ;;  %vm1312_vm7 = vcmp.lt.f32.partialorder %v240_v43, 0.0004427343  ;;  %v255_v49 = vmul.f32 -0.5, %v1251_v19 }
  0x5d   :  { %v917_v18 = vpop.eup %916  ;;  %v1310_v15 = vmul.f32 0.6931472, %v915_v51  ;;  %930 = vlog2.f32 %v252_v45  ;;  %v1324_v32 = vmul.f32 %v1240_v55, %v238_v38  ;;  %v258_v7 = vand.u32 2147483647, %v1251_v19 }
  0x5e   :  { %v919_v52 = vpop.eup %918  ;;  %v179_v27 = vsel %vm1247_vm0, %v1245_v62, %v1306_v22  ;;  %v1321_v50 = vmul.f32 0.6931472, %v917_v18  ;;  %v1330_v45 = vmul.f32 %v1243_v61, %v247_v12  ;;  %vm1332_vm8 = vcmp.lt.f32.partialorder %v249_v40, 0.0004427343 }
  0x5f   :  { %v921_v43 = vpop.eup %920  ;;  %v1327_v47 = vmul.f32 0.6931472, %v919_v52  ;;  %v256_v10 = vadd.f32 1.0, %v255_v49  ;;  %v261_v9 = vadd.f32 1.0, %v1255_v34  ;;  %v188_v38 = vsel %vm1257_vm1, %v1253_v24, %v1310_v15 }
  0x60   :  { %v923_v18 = vpop.eup %922  ;;  %v197_v55 = vsel %vm1263_vm2, %v1261_v20, %v1321_v50  ;;  %v1345_v61 = vmul.f32 0.6931472, %v921_v43  ;;  %v264_v40 = vmul.f32 -0.5, %v1255_v34  ;;  %vm1354_vm9 = vcmp.lt.f32.partialorder %v258_v7, 0.0004427343  ;;  %v332_v20 = vld [vmem:[#allocation7 + $0x8] sm:$0xff] }
  0x61   :  { %v1352_v49 = vmul.f32 0.6931472, %v923_v18  ;;  %932 = vlog2.f32 %v261_v9  ;;  %v1359_v24 = vmul.f32 %v1251_v19, %v256_v10  ;;  %v267_v43 = vand.u32 2147483647, %v1255_v34 }
  0x62   :  { %v925_v15 = vpop.eup %924  ;;  %v265_v35 = vadd.f32 1.0, %v264_v40  ;;  %v270_v63 = vadd.f32 1.0, %v1267_v26  ;;  %v215_v18 = vsel %vm1279_vm4, %v1287_v56, %v1345_v61  ;;  %v273_v7 = vmul.f32 -0.5, %v1267_v26 }
  0x63   :  { %v1367_v60 = vmul.f32 0.6931472, %v925_v15  ;;  %v276_v9 = vand.u32 2147483647, %v1267_v26  ;;  %v927_v12 = vpop.eup %926  ;;  %v224_v10 = vsel %vm1289_vm5, %v1298_v23, %v1352_v49  ;;  %v279_v40 = vadd.f32 1.0, %v1273_v48 }
  0x64   :  { %v1376_v19 = vmul.f32 %v1255_v34, %v265_v35  ;;  %934 = vlog2.f32 %v270_v63  ;;  %v236_v59 = vmul.f32 0.6931472, %v927_v12  ;;  %vm1383_vm10 = vcmp.lt.f32.partialorder %v267_v43, 0.0004427343 }
  0x65   :  { %v233_v56 = vsel %vm1300_vm6, %v1308_v58, %v1367_v60  ;;  %v274_v15 = vadd.f32 1.0, %v273_v7  ;;  %v929_v57 = vpop.eup %928  ;;  %936 = vlog2.f32 %v279_v40  ;;  %v282_v23 = vmul.f32 -0.5, %v1273_v48 }
  0x66   :  { %v285_v34 = vand.u32 2147483647, %v1273_v48  ;;  %v288_v63 = vadd.f32 1.0, %v1277_v53  ;;  %v242_v42 = vsel %vm1312_vm7, %v1324_v32, %v236_v59  ;;  %v245_v60 = vmul.f32 0.6931472, %v929_v57 }
  0x67   :  { %v931_v36 = vpop.eup %930  ;;  %vm1393_vm11 = vcmp.lt.f32.partialorder %v276_v9, 0.0004427343  ;;  %v291_v12 = vmul.f32 -0.5, %v1277_v53  ;;  %v275_v35 = vmul.f32 %v1267_v26, %v274_v15  ;;  %v283_v43 = vadd.f32 1.0, %v282_v23 }
  0x68   :  { %v254_v49 = vmul.f32 0.6931472, %v931_v36  ;;  %938 = vlog2.f32 %v288_v63  ;;  %vm1399_vm12 = vcmp.lt.f32.partialorder %v285_v34, 0.0004427343  ;;  %v294_v46 = vand.u32 2147483647, %v1277_v53 }
  0x69   :  { %v292_v40 = vadd.f32 1.0, %v291_v12  ;;  %v297_v57 = vadd.f32 1.0, %v1285_v30  ;;  %v251_v32 = vsel %vm1332_vm8, %v1330_v45, %v245_v60  ;;  %v300_v26 = vmul.f32 -0.5, %v1285_v30 }
  0x6a   :  { %v260_v9 = vsel %vm1354_vm9, %v1359_v24, %v254_v49  ;;  %v303_v59 = vand.u32 2147483647, %v1285_v30  ;;  %v284_v23 = vmul.f32 %v1273_v48, %v283_v43  ;;  %v306_v63 = vadd.f32 1.0, %v1294_v28 }
  0x6b   :  { %v933_v15 = vpop.eup %932  ;;  %v1415_v34 = vmul.f32 %v1277_v53, %v292_v40  ;;  %940 = vlog2.f32 %v297_v57  ;;  %vm1418_vm13 = vcmp.lt.f32.partialorder %v294_v46, 0.0004427343  ;;  %v301_v51 = vadd.f32 1.0, %v300_v26  ;;  %v337_v40 = vld [vmem:[#allocation7 + $0x30] sm:$0xff]  ;;  %v338_v57 = vld [vmem:[#allocation7 + $0x38] sm:$0xff] }
  0x6c   :  { %v263_v36 = vmul.f32 0.6931472, %v933_v15  ;;  %v309_v52 = vmul.f32 -0.5, %v1294_v28  ;;  %vm1423_vm14 = vcmp.lt.f32.partialorder %v303_v59, 0.0004427343  ;;  %942 = vlog2.f32 %v306_v63  ;;  %v341_v15 = vld [vmem:[#allocation7 + $0x50] sm:$0xff] }
  0x6d   :  { %v312_v48 = vand.u32 2147483647, %v1294_v28  ;;  %v1435_v53 = vadd.f32 %v179_v27, %v91_v21  ;;  %v1439_v60 = vadd.f32 %v188_v38, %v92_v25  ;;  %v1445_v43 = vmul.f32 %v1285_v30, %v301_v51  ;;  %v342_v63 = vld [vmem:[#allocation7 + $0x58] sm:$0xff] }
  0x6e   :  { %v935_v12 = vpop.eup %934  ;;  %v269_v49 = vsel %vm1383_vm10, %v1376_v19, %v263_v36  ;;  %v310_v0 = vadd.f32 1.0, %v309_v52  ;;  %v1454_v21 = vadd.f32 %v197_v55, %v93_v54  ;;  %v1772_v22 = vmax.f32 %v1183_v3, 0.0  ;;  %v331_v54 = vld [vmem:[#allocation7] sm:$0xff]  ;;  %v334_v55 = vld [vmem:[#allocation7 + $0x18] sm:$0xff] }
  0x6f   :  { %v272_v1 = vmul.f32 0.6931472, %v935_v12  ;;  %vm1456_vm15 = vcmp.lt.f32.partialorder %v312_v48, 0.0004427343  ;;  %v1773_v62 = vsel %vm1269_vm3, %v1275_v31, %v1327_v47  ;;  %v1471_v39 = vadd.f32 %v215_v18, %v1774_v6  ;;  %v937_v30 = vpop.eup %936  ;;  %v343_v52 = vld [vmem:[#allocation7 + $0x60] sm:$0xff]  ;;  %v1527_v6 = vld [vmem:[#allocation2 + $0x8] sm:$0xff] }
  0x70   :  { %v1467_v2 = vadd.f32 %v1773_v62, %v1772_v22  ;;  %v1474_v27 = vmul.f32 %v1294_v28, %v310_v0  ;;  %v1775_v50 = vmax.f32 %v1187_v5, 0.0  ;;  %v1776_v44 = vmax.f32 %v1191_v8, 0.0  ;;  %v335_v8 = vld [vmem:[#allocation7 + $0x20] sm:$0xff]  ;;  %v344_v0 = vld [vmem:[#allocation7 + $0x68] sm:$0xff] }
  0x71   :  { %v1777_v31 = vmax.f32 %v1195_v11, 0.0  ;;  %v278_v18 = vsel %vm1393_vm11, %v275_v35, %v272_v1  ;;  %v281_v19 = vmul.f32 0.6931472, %v937_v30  ;;  %v1778_v28 = vmax.f32 %v1198_v13, 0.0  ;;  %v339_v13 = vld [vmem:[#allocation7 + $0x40] sm:$0xff] }
  0x72   :  { %v1478_v3 = vadd.f32 %v224_v10, %v1775_v50  ;;  %v1482_v38 = vadd.f32 %v233_v56, %v1776_v44  ;;  %v1779_v5 = vmax.f32 %v1200_v14, 0.0  ;;  %v336_v56 = vld [vmem:[#allocation7 + $0x28] sm:$0xff]  ;;  %v939_v11 = vpop.eup %938  ;;  %v1781_v58 = vmax.f32 %v1205_v17, 0.0  ;;  %v1525_v62 = vld [vmem:[#allocation2] sm:$0xff] }
  0x73   :  { %v1486_v47 = vadd.f32 %v242_v42, %v1777_v31  ;;  %v1492_v61 = vadd.f32 %v251_v32, %v1778_v28  ;;  %v1780_v42 = vmax.f32 %v1203_v16, 0.0  ;;  %v340_v32 = vld [vmem:[#allocation7 + $0x48] sm:$0xff]  ;;  %v347_v26 = vmul.f32 %v331_v54, %v1435_v53  ;;  %v1529_v54 = vld [vmem:[#allocation2 + $0x10] sm:$0xff]  ;;  %v1537_v31 = vld [vmem:[#allocation2 + $0x18] sm:$0xff] }
  0x74   :  { %v1496_v10 = vadd.f32 %v260_v9, %v1779_v5  ;;  %v1504_v35 = vadd.f32 %v278_v18, %v1781_v58  ;;  %v348_v14 = vmul.f32 %v332_v20, %v1439_v60  ;;  %v287_v9 = vsel %vm1399_vm12, %v284_v23, %v281_v19  ;;  %v1547_v5 = vld [vmem:[#allocation2 + $0x30] sm:$0xff] }
  0x75   :  { %v1500_v46 = vadd.f32 %v269_v49, %v1780_v42  ;;  %v290_v59 = vmul.f32 0.6931472, %v939_v11  ;;  %v349_v16 = vmul.f32 %v333_v4, %v1454_v21  ;;  %v350_v36 = vmul.f32 %v334_v55, %v1467_v2  ;;  %v941_v7 = vpop.eup %940  ;;  %v1539_v4 = vld [vmem:[#allocation2 + $0x20] sm:$0xff]  ;;  %v1541_v55 = vld [vmem:[#allocation2 + $0x28] sm:$0xff]  ;;  %v345_v11 = vld [vmem:[#allocation7 + $0x70] sm:$0xff] }
  0x76   :  { %v1782_v17 = vmax.f32 %v1213_v29, 0.0  ;;  %v351_v48 = vmul.f32 %v335_v8, %v1471_v39  ;;  %v352_v12 = vmul.f32 %v336_v56, %v1478_v3  ;;  %v353_v49 = vmul.f32 %v337_v40, %v1482_v38  ;;  %v943_v44 = vpop.eup %942  ;;  %v1549_v8 = vld [vmem:[#allocation2 + $0x38] sm:$0xff] }
  0x77   :  { %v296_v23 = vsel %vm1418_vm13, %v1415_v34, %v290_v59  ;;  %v354_v1 = vmul.f32 %v338_v57, %v1486_v47  ;;  %v355_v22 = vmul.f32 %v339_v13, %v1492_v61  ;;  %v356_v29 = vmul.f32 %v340_v32, %v1496_v10  ;;  %v1556_v57 = vld [vmem:[#allocation2 + $0x40] sm:$0xff]  ;;  %v1558_v13 = vld [vmem:[#allocation2 + $0x48] sm:$0xff]  ;;  %v1560_v32 = vld [vmem:[#allocation2 + $0x50] sm:$0xff] }
  0x78   :  { %v1514_v51 = vadd.f32 %v287_v9, %v1782_v17  ;;  %v299_v20 = vmul.f32 0.6931472, %v941_v7  ;;  %v1783_v30 = vmax.f32 %v1217_v33, 0.0  ;;  %v357_v34 = vmul.f32 %v341_v15, %v1500_v46  ;;  %v1567_v59 = vld [vmem:[#allocation2 + $0x58] sm:$0xff]  ;;  %v73_v15 = vld [vmem:[#allocation2 + $0x70] sm:$0xff] }
  0x79   :  { %v358_v45 = vmul.f32 %v342_v63, %v1504_v35  ;;  %v363_v19 = vadd.f32 %v347_v26, %v1525_v62  ;;  %v364_v28 = vadd.f32 %v348_v14, %v1527_v6  ;;  %v365_v33 = vadd.f32 %v349_v16, %v1529_v54  ;;  %v346_v16 = vld [vmem:[#allocation7 + $0x78] sm:$0xff] }
  0x7a   :  { %v1533_v50 = vadd.f32 %v296_v23, %v1783_v30  ;;  %v359_v18 = vmul.f32 %v343_v52, %v1514_v51  ;;  %v305_v56 = vsel %vm1423_vm14, %v1445_v43, %v299_v20  ;;  %v308_v40 = vmul.f32 0.6931472, %v943_v44  ;;  %v1575_v52 = vld [vmem:[#allocation2 + $0x60] sm:$0xff] }
  0x7b   :  { %v366_v58 = vadd.f32 %v350_v36, %v1537_v31  ;;  %v1784_v26 = vmax.f32 %v1219_v37, 0.0  ;;  %v367_v9 = vadd.f32 %v351_v48, %v1539_v4  ;;  %v368_v24 = vadd.f32 %v352_v12, %v1541_v55  ;;  %v1577_v48 = vld [vmem:[#allocation2 + $0x68] sm:$0xff] }
  0x7c   :  { %v360_v42 = vmul.f32 %v344_v0, %v1533_v50  ;;  %v369_v43 = vadd.f32 %v353_v49, %v1547_v5  ;;  %v314_v63 = vsel %vm1456_vm15, %v1474_v27, %v308_v40  ;;  %v370_v36 = vadd.f32 %v354_v1, %v1549_v8  ;;  %v74_v27 = vld [vmem:[#allocation2 + $0x78] sm:$0xff] }
  0x7d   :  { %v329_v14 = vadd.f32 %v305_v56, %v1784_v26  ;;  %v371_v17 = vadd.f32 %v355_v22, %v1556_v57  ;;  %v372_v37 = vadd.f32 %v356_v29, %v1558_v13  ;;  %v1785_v12 = vmax.f32 %v1221_v41, 0.0 }
  0x7e   :  { %v373_v23 = vadd.f32 %v357_v34, %v1560_v32  ;;  %v374_v25 = vadd.f32 %v358_v45, %v1567_v59  ;;  %v375_v0 = vadd.f32 %v359_v18, %v1575_v52  ;;  %v376_v1 = vadd.f32 %v360_v42, %v1577_v48 }
  0x7f   :  { %v330_v49 = vadd.f32 %v314_v63, %v1785_v12  ;;  %v361_v7 = vmul.f32 %v345_v11, %v329_v14  ;;  %v824_v22 = vpack.c.bf16 %v364_v28, %v363_v19  ;;  %v829_v20 = vpack.c.bf16 %v366_v58, %v365_v33 }
  0x80   :  { %v834_v44 = vpack.c.bf16 %v368_v24, %v367_v9  ;;  %v839_v56 = vpack.c.bf16 %v370_v36, %v369_v43  ;;  %v844_v41 = vpack.c.bf16 %v372_v37, %v371_v17  ;;  %v849_v40 = vpack.c.bf16 %v374_v25, %v373_v23 }
  0x81   :  { %v362_v29 = vmul.f32 %v346_v16, %v330_v49  ;;  %v377_v30 = vadd.f32 %v361_v7, %v73_v15  ;;  %825 = vst [vmem:[#allocation8] sm:$0xff] %v824_v22   ;;  %861 = vst [vmem:[#allocation8 + $0x8] sm:$0xff] %v829_v20   ;;  %v854_v11 = vpack.c.bf16 %v376_v1, %v375_v0  ;;  %v529_v34 = vadd.f32 1e-15, %v1435_v53 }
  0x82   :  { %862 = vst [vmem:[#allocation8 + $0x10] sm:$0xff] %v834_v44   ;;  %863 = vst [vmem:[#allocation8 + $0x18] sm:$0xff] %v839_v56   ;;  %v530_v45 = vadd.f32 1e-15, %v1439_v60  ;;  %v531_v18 = vadd.f32 1e-15, %v1454_v21  ;;  %v460_v42 = vlaneseq  ;;  %v609_v43 = vmul.f32 %v1525_v62, %v1525_v62 }
  0x83   :  { %v378_v26 = vadd.f32 %v362_v29, %v74_v27  ;;  %864 = vst [vmem:[#allocation8 + $0x20] sm:$0xff] %v844_v41   ;;  %865 = vst [vmem:[#allocation8 + $0x28] sm:$0xff] %v849_v40   ;;  %944 = vlog2.f32 %v529_v34  ;;  %v532_v28 = vadd.f32 1e-15, %v1467_v2  ;;  %v533_v33 = vadd.f32 1e-15, %v1471_v39 }
  0x84   :  { %866 = vst [vmem:[#allocation8 + $0x30] sm:$0xff] %v854_v11   ;;  %946 = vlog2.f32 %v530_v45  ;;  %v534_v58 = vadd.f32 1e-15, %v1478_v3  ;;  %v535_v14 = vadd.f32 1e-15, %v1482_v38  ;;  %v1593_v9 = vand.u32 127, %v460_v42 }
  0x85   :  { %v859_v19 = vpack.c.bf16 %v378_v26, %v377_v30  ;;  %948 = vlog2.f32 %v531_v18  ;;  %v536_v24 = vadd.f32 1e-15, %v1486_v47  ;;  %v610_v15 = vmul.f32 %v1527_v6, %v1527_v6 }
  0x86   :  { %950 = vlog2.f32 %v532_v28  ;;  %v611_v63 = vmul.f32 %v1529_v54, %v1529_v54  ;;  %v612_v16 = vmul.f32 %v1537_v31, %v1537_v31  ;;  %v613_v36 = vmul.f32 %v1539_v4, %v1539_v4 }
  0x87   :  { %867 = vst [vmem:[#allocation8 + $0x38] sm:$0xff] %v859_v19   ;;  %952 = vlog2.f32 %v533_v33  ;;  %v593_v37 = vmul.f32 %v1435_v53, %v1435_v53  ;;  %v594_v62 = vmul.f32 %v1439_v60, %v1439_v60  ;;  %v614_v6 = vmul.f32 %v1541_v55, %v1541_v55 }
  0x88   :  { %954 = vlog2.f32 %v534_v58  ;;  %v615_v12 = vmul.f32 %v1547_v5, %v1547_v5  ;;  %v537_v49 = vadd.f32 1e-15, %v1492_v61  ;;  %v1617_v31 = vmul.f32 %v1549_v8, %v1549_v8 }
  0x89   :  { %956 = vlog2.f32 %v535_v14  ;;  %v1621_v53 = vmul.f32 %v1556_v57, %v1556_v57  ;;  %v538_v60 = vadd.f32 1e-15, %v1496_v10  ;;  %v595_v4 = vmul.f32 %v1454_v21, %v1454_v21 }
  0x8a   :  { %958 = vlog2.f32 %v536_v24  ;;  %v1628_v55 = vmul.f32 %v1558_v13, %v1558_v13  ;;  %v539_v7 = vadd.f32 1e-15, %v1500_v46  ;;  %v596_v8 = vmul.f32 %v1467_v2, %v1467_v2 }
  0x8b   :  { %v1635_v57 = vmul.f32 %v1560_v32, %v1560_v32  ;;  %v1639_v27 = vmul.f32 %v1567_v59, %v1567_v59  ;;  %v625_v21 = vadd.f32 %v609_v43, %v593_v37  ;;  %v626_v0 = vadd.f32 %v610_v15, %v594_v62 }
  0x8c   :  { %v540_v1 = vadd.f32 1e-15, %v1504_v35  ;;  %960 = vlog2.f32 %v537_v49  ;;  %v597_v22 = vmul.f32 %v1471_v39, %v1471_v39  ;;  %v1646_v2 = vmul.f32 %v1575_v52, %v1575_v52 }
  0x8d   :  { %v945_v17 = vpop.eup %944  ;;  %v541_v32 = vadd.f32 1e-15, %v1514_v51  ;;  %962 = vlog2.f32 %v538_v60  ;;  %v627_v29 = vadd.f32 %v611_v63, %v595_v4  ;;  %v598_v44 = vmul.f32 %v1478_v3, %v1478_v3 }
  0x8e   :  { %v947_v54 = vpop.eup %946  ;;  %v546_v23 = vmul.f32 0.6931472, %v945_v17  ;;  %964 = vlog2.f32 %v539_v7  ;;  %v628_v56 = vadd.f32 %v612_v16, %v596_v8  ;;  %v642_v11 = vmul.f32 0.5, %v625_v21 }
  0x8f   :  { %v949_v5 = vpop.eup %948  ;;  %v548_v25 = vmul.f32 0.6931472, %v947_v54  ;;  %v643_v39 = vmul.f32 0.5, %v626_v0  ;;  %vm512_vm0 = vcmp.lt.s32.totalorder %v1593_v9, 8  ;;  %v542_v52 = vadd.f32 1e-15, %v1533_v50 }
  0x90   :  { %v951_v13 = vpop.eup %950  ;;  %v550_v20 = vmul.f32 0.6931472, %v949_v5  ;;  %v577_v30 = vsub.f32 0.0, %v546_v23  ;;  %v599_v26 = vmul.f32 %v1482_v38, %v1482_v38  ;;  %v1657_v45 = vmul.f32 %v1577_v48, %v1577_v48 }
  0x91   :  { %v953_v59 = vpop.eup %952  ;;  %v552_v41 = vmul.f32 0.6931472, %v951_v13  ;;  %v578_v40 = vsub.f32 0.0, %v548_v25  ;;  %v629_v18 = vadd.f32 %v613_v36, %v597_v22  ;;  %966 = vlog2.f32 %v540_v1 }
  0x92   :  { %v955_v34 = vpop.eup %954  ;;  %v554_v19 = vmul.f32 0.6931472, %v953_v59  ;;  %v579_v3 = vsub.f32 0.0, %v550_v20  ;;  %v644_v28 = vmul.f32 0.5, %v627_v29  ;;  %968 = vlog2.f32 %v541_v32 }
  0x93   :  { %v957_v33 = vpop.eup %956  ;;  %v600_v58 = vmul.f32 %v1486_v47, %v1486_v47  ;;  %v630_v14 = vadd.f32 %v614_v6, %v598_v44  ;;  %v645_v24 = vmul.f32 0.5, %v628_v56  ;;  %v556_v15 = vmul.f32 0.6931472, %v955_v34 }
  0x94   :  { %v959_v43 = vpop.eup %958  ;;  %v580_v63 = vsub.f32 0.0, %v552_v41  ;;  %v658_v38 = vadd.f32 %v642_v11, %v577_v30  ;;  %v659_v16 = vadd.f32 %v643_v39, %v578_v40  ;;  %970 = vlog2.f32 %v542_v52 }
  0x95   :  { %v601_v48 = vmul.f32 %v1492_v61, %v1492_v61  ;;  %v602_v36 = vmul.f32 %v1496_v10, %v1496_v10  ;;  %v631_v17 = vadd.f32 %v615_v12, %v599_v26  ;;  %v558_v37 = vmul.f32 0.6931472, %v957_v33 }
  0x96   :  { %v581_v62 = vsub.f32 0.0, %v554_v19  ;;  %v646_v54 = vmul.f32 0.5, %v629_v18  ;;  %v660_v49 = vadd.f32 %v644_v28, %v579_v3  ;;  %v961_v47 = vpop.eup %960  ;;  %v560_v6 = vmul.f32 0.6931472, %v959_v43 }
  0x97   :  { %v603_v60 = vmul.f32 %v1500_v46, %v1500_v46  ;;  %v632_v4 = vadd.f32 %v1617_v31, %v600_v58  ;;  %v647_v5 = vmul.f32 0.5, %v630_v14  ;;  %v963_v7 = vpop.eup %962  ;;  %v582_v23 = vsub.f32 0.0, %v556_v15 }
  0x98   :  { %v661_v8 = vadd.f32 %v645_v24, %v580_v63  ;;  %v789_v61 = vadd.f32 -0.5, %v658_v38  ;;  %v790_v25 = vadd.f32 -0.5, %v659_v16  ;;  %v965_v21 = vpop.eup %964  ;;  %v604_v10 = vmul.f32 %v1504_v35, %v1504_v35 }
  0x99   :  { %v605_v12 = vmul.f32 %v1514_v51, %v1514_v51  ;;  %v633_v0 = vadd.f32 %v1621_v53, %v601_v48  ;;  %v648_v13 = vmul.f32 0.5, %v631_v17  ;;  %v562_v1 = vmul.f32 0.6931472, %v961_v47 }
  0x9a   :  { %v583_v46 = vsub.f32 0.0, %v558_v37  ;;  %v662_v22 = vadd.f32 %v646_v54, %v581_v62  ;;  %v791_v31 = vadd.f32 -0.5, %v660_v49  ;;  %v564_v32 = vmul.f32 0.6931472, %v963_v7 }
  0x9b   :  { %v584_v20 = vsub.f32 0.0, %v560_v6  ;;  %v634_v29 = vadd.f32 %v1628_v55, %v602_v36  ;;  %v649_v59 = vmul.f32 0.5, %v632_v4  ;;  %v967_v30 = vpop.eup %966  ;;  %v663_v44 = vadd.f32 %v647_v5, %v582_v23 }
  0x9c   :  { %v792_v56 = vadd.f32 -0.5, %v661_v8  ;;  %v690_v35 = vsel %vm512_vm0, %v789_v61, 0.0  ;;  %v691_v51 = vsel %vm512_vm0, %v790_v25, 0.0  ;;  %v969_v53 = vpop.eup %968  ;;  %v566_v41 = vmul.f32 0.6931472, %v965_v21 }
  0x9d   :  { %v606_v40 = vmul.f32 %v1533_v50, %v1533_v50  ;;  %v635_v11 = vadd.f32 %v1635_v57, %v603_v60  ;;  %v650_v39 = vmul.f32 0.5, %v633_v0  ;;  %v585_v34 = vsub.f32 0.0, %v562_v1 }
  0x9e   :  { %v664_v55 = vadd.f32 %v648_v13, %v583_v46  ;;  %v793_v52 = vadd.f32 -0.5, %v662_v22  ;;  %v692_v26 = vsel %vm512_vm0, %v791_v31, 0.0  ;;  %v971_v18 = vpop.eup %970  ;;  %v568_v19 = vmul.f32 0.6931472, %v967_v30 }
  0x9f   :  { %v636_v3 = vadd.f32 %v1639_v27, %v604_v10  ;;  %v651_v28 = vmul.f32 0.5, %v634_v29  ;;  %v706_v33 = vadd.f32 %v691_v51, %v690_v35  ;;  %v586_v58 = vsub.f32 0.0, %v564_v32 }
  0xa0   :  { %v665_v14 = vadd.f32 %v649_v59, %v584_v20  ;;  %v794_v24 = vadd.f32 -0.5, %v663_v44  ;;  %v693_v50 = vsel %vm512_vm0, %v792_v56, 0.0  ;;  %v570_v57 = vmul.f32 0.6931472, %v969_v53 }
  0xa1   :  { %v637_v43 = vadd.f32 %v1646_v2, %v605_v12  ;;  %v652_v15 = vmul.f32 0.5, %v635_v11  ;;  %v707_v63 = vadd.f32 %v706_v33, %v692_v26  ;;  %v587_v38 = vsub.f32 0.0, %v566_v41 }
  0xa2   :  { %v666_v16 = vadd.f32 %v650_v39, %v585_v34  ;;  %v795_v48 = vadd.f32 -0.5, %v664_v55  ;;  %v694_v36 = vsel %vm512_vm0, %v793_v52, 0.0  ;;  %v572_v27 = vmul.f32 0.6931472, %v971_v18 }
  0xa3   :  { %v638_v17 = vadd.f32 %v1657_v45, %v606_v40  ;;  %v653_v37 = vmul.f32 0.5, %v636_v3  ;;  %v708_v62 = vadd.f32 %v707_v63, %v693_v50  ;;  %v588_v54 = vsub.f32 0.0, %v568_v19 }
  0xa4   :  { %v667_v49 = vadd.f32 %v651_v28, %v586_v58  ;;  %v796_v47 = vadd.f32 -0.5, %v665_v14  ;;  %v695_v6 = vsel %vm512_vm0, %v794_v24, 0.0  ;;  %v461_v2 = vshrl.u32 %v460_v42, 7 }
  0xa5   :  { %v654_v60 = vmul.f32 0.5, %v637_v43  ;;  %v709_v4 = vadd.f32 %v708_v62, %v694_v36  ;;  %v589_v5 = vsub.f32 0.0, %v570_v57  ;;  %v668_v7 = vadd.f32 %v652_v15, %v587_v38 }
  0xa6   :  { %v797_v23 = vadd.f32 -0.5, %v666_v16  ;;  %v696_v8 = vsel %vm512_vm0, %v795_v48, 0.0  ;;  %v655_v61 = vmul.f32 0.5, %v638_v17  ;;  %v590_v25 = vsub.f32 0.0, %v572_v27 }
  0xa7   :  { %v710_v45 = vadd.f32 %v709_v4, %v695_v6  ;;  %v669_v21 = vadd.f32 %v653_v37, %v588_v54  ;;  %v798_v10 = vadd.f32 -0.5, %v667_v49  ;;  %v697_v12 = vsel %vm512_vm0, %v796_v47, 0.0 }
  0xa8   :  { %v474_v13 = vadd.s32 104, %v461_v2  ;;  %v670_v1 = vadd.f32 %v654_v60, %v589_v5  ;;  %v799_v42 = vadd.f32 -0.5, %v668_v7  ;;  %v698_v46 = vsel %vm512_vm0, %v797_v23, 0.0 }
  0xa9   :  { %v711_v0 = vadd.f32 %v710_v45, %v696_v8  ;;  %v671_v31 = vadd.f32 %v655_v61, %v590_v25  ;;  %v800_v32 = vadd.f32 -0.5, %v669_v21  ;;  %v699_v20 = vsel %vm512_vm0, %v798_v10, 0.0 }
  0xaa   :  { %vm509_vm1 = vcmp.lt.s32.totalorder %v474_v13, 109  ;;  %v801_v59 = vadd.f32 -0.5, %v670_v1  ;;  %v700_v30 = vsel %vm512_vm0, %v799_v42, 0.0  ;;  %vm735_vm3 = vcmask 0  }
  0xab   :  { %v712_v22 = vadd.f32 %v711_v0, %v697_v12  ;;  %v802_v56 = vadd.f32 -0.5, %v671_v31  ;;  %v701_v35 = vsel %vm512_vm0, %v800_v32, 0.0  ;;  %vm526_vm2 = vmand %vm509_vm1, %vm512_vm0  ;;  %v1095_v34 = vmov 0.0  }
  0xac   :  { %v702_v53 = vsel %vm512_vm0, %v801_v59, 0.0  ;;  %736 = vst.msk [vmem:[#allocation9] sm:$0x1] %vm735_vm3, %v1095_v34 }
  0xad   :  { %v713_v29 = vadd.f32 %v712_v22, %v698_v46  ;;  %v703_v40 = vsel %vm526_vm2, %v802_v56, 0.0 }
  0xaf   :  { %v714_v44 = vadd.f32 %v713_v29, %v699_v20 }
  0xb1   :  { %v715_v51 = vadd.f32 %v714_v44, %v700_v30 }
  0xb3   :  { %v716_v41 = vadd.f32 %v715_v51, %v701_v35 }
  0xb5   :  { %v717_v11 = vadd.f32 %v716_v41, %v702_v53 }
  0xb7   :  { %v718_v39 = vadd.f32 %v717_v11, %v703_v40 }
  0xb9   :  { %721 = vadd.xlane.f32.xlu0 %v718_v39 }
  0xba   :  { %1049 = shalt.err (!%p1046_p0)
}
  0xbb   :  { %s1050_s29 = scalar_lea.hbm %s1738_s3, 1024 }
  0xbc   :  { %p1051_p1 = scmp.ne.s32.totalorder %s1738_s3, %s1050_s29  ;;  %p1054_p2 = scmp.lt.u32.totalorder %s1050_s29, %s1738_s3 }
  0xbe   :  { %p1056_p3 = pnand %p1054_p2, %p1051_p1 }
  0xc0   :  { %1059 = shalt.err (!%p1056_p3)
}
  0xc1   :  { %s1097_s8 = smov 64   ;;  %s1098_s9 = smov 4   ;;  %v737_v28 = vld [vmem:[#allocation9] sm:$0x1] }
  0xc2   :  { %752 = dma.vmem_to_hbm [thread:$0]  %s747_s25, 1024, %s1738_s3, [#allocation4], %s1097_s8, %s1097_s8, %s1098_s9  }
  0xc3   :  { %s1099_s12 = smov [#allocation9]  }
  0xc4   :  { %s759_s1 = sshll.u32 %s1099_s12, 4  ;;  %s760_s1 = int_to_ptr.vmem [resolvable:$true] %s759_s1 }
  0xc5   :  { %s1060_s14 = scalar_lea.vmem %s760_s1, 16  ;;  %s1064_s3 = scalar_lea.vmem %s760_s1, 32 }
  0xc6   :  { %p1061_p4 = scmp.ne.s32.totalorder %s760_s1, %s1060_s14  ;;  %p1065_p5 = scmp.lt.s32.totalorder %s760_s1, %s760_s1 }
  0xc7   :  { %p1066_p6 = scmp.lt.s32.totalorder %s1064_s3, %s1060_s14 }
  0xc9   :  { %p1067_p7 = por %p1066_p6, %p1065_p5 }
  0xcb   :  { %p1068_p8 = pnand %p1067_p7, %p1061_p4 }
 0x146   :  { %v722_v9 = vpop.xlane.xlu0 %721 }
 0x147   :  { %v723_v55 = vrot.slane %v722_v9, 4 }
 0x149   :  { %v724_v52 = vadd.f32 %v723_v55, %v722_v9 }
 0x14b   :  { %v725_v26 = vrot.slane %v724_v52, 2 }
 0x14d   :  { %v726_v18 = vadd.f32 %v725_v26, %v724_v52 }
 0x14f   :  { %v727_v19 = vrot.slane %v726_v18, 1 }
 0x151   :  { %v728_v3 = vadd.f32 %v727_v19, %v726_v18 }
 0x153   :  { %868 = vpush %v728_v3 }
 0x184   :  { %s869_s13 = spop %868 }
 0x185   :  { %v730_v33 = vstv %s869_s13 }
 0x186   :  { %v738_v58 = vadd.f32 %v737_v28, %v730_v33 }
 0x188   :  { %740 = vst.msk [vmem:[#allocation9] sm:$0x1] %vm735_vm3, %v738_v58 }
 0x189   :  { %1071 = shalt.err (!%p1068_p8)
}
 0x18a   :  { %s1072_s17 = scalar_lea.hbm %s1739_s4, 16 }
 0x18b   :  { %p1073_p9 = scmp.ne.s32.totalorder %s1739_s4, %s1072_s17  ;;  %p1076_p10 = scmp.lt.u32.totalorder %s1072_s17, %s1739_s4 }
 0x18d   :  { %p1078_p11 = pnand %p1076_p10, %p1073_p9 }
 0x18f   :  { %1081 = shalt.err (!%p1078_p11)
}
 0x190   :  { %762 = dma.vmem_to_hbm [thread:$0]  %s760_s1, 16, %s1739_s4, [#allocation10]  }
 0x191   :  { %1086 = dma.done.wait [#allocation4], 1024  }
 0x192   :  { %1087 = vsyncadd [#allocation4], 4294966272 }
 0x193   :  { %1088 = dma.done.wait [#allocation10], 16  }
 0x194   :  { %1089 = vsyncadd [#allocation10], 4294967280 }
 0x195   :  { %769 = vsyncpa [#allocation3], 1 }
 0x196   :  { %770 = vsyncpa [#allocation6], 1 }
 0x197   :  { %771 = vsyncpa [#allocation4], 1 }
 0x198   :  { %772 = vsyncpa [#allocation10], 1 }

</bundles_post_ra>
